<compile_context>
chip_gen: v7x
topology: tpu7x:2x2x1
jax: 0.10.0
libtpu: 0.0.40
codegen_flags: <defaults>
</compile_context>

<pallas_src>
import jax
import jax.numpy as jnp
from jax.experimental import pallas as pl
from jax.experimental.pallas import tpu as pltpu

HIDDEN = 256
_ALIGN = 16   # bf16 sublane packing (2nd-minor tile)
_LANES = 128


def _round_up(x, m):
    return ((x + m - 1) // m) * m


def _actor_kernel(act_ref, x_ref,
                  w1_ref, b1_ref, w2_ref, b2_ref, w3_ref, b3_ref,
                  w4_ref, b4_ref, w5_ref, b5_ref,
                  o_ref):
    """x_ref is bf16 (tb, d_in_pad); weights bf16, biases f32; output f32."""

    def dense(h_bf16, w_ref, b_ref):
        # MXU matmul with f32 accumulation; bias add stays f32 on the VPU.
        y = jnp.dot(h_bf16, w_ref[...], preferred_element_type=jnp.float32)
        return y + b_ref[...]

    h = jnp.maximum(dense(x_ref[...], w1_ref, b1_ref), 0.0)
    h = jnp.maximum(dense(h.astype(jnp.bfloat16), w2_ref, b2_ref), 0.0)
    h = jnp.maximum(dense(h.astype(jnp.bfloat16), w3_ref, b3_ref), 0.0)
    h = jnp.maximum(dense(h.astype(jnp.bfloat16), w4_ref, b4_ref), 0.0)
    y = dense(h.astype(jnp.bfloat16), w5_ref, b5_ref)

    act_limit = act_ref[0, 0]                      # SMEM scalar
    o_ref[...] = (jnp.tanh(y) * act_limit).astype(o_ref.dtype)


def actor_forward(obs, params, act_limit, *, batch_block=512):
    """obs: (B, d_input) float32.  params: dict of bf16 weights / f32 biases.
    Returns (B, d_output) float32."""
    B, d_in = obs.shape
    d_out = params["w5"].shape[1]

    d_in_pad = max(_LANES, _round_up(d_in, _LANES))
    d_out_pad = max(_LANES, _round_up(d_out, _LANES))

    # ---- batch tiling: padded cdiv grid, >=2 steps when batch allows it ----
    batch_block = max(_ALIGN, _round_up(batch_block, _ALIGN))
    B_pad = max(_ALIGN, _round_up(B, _ALIGN))
    if B_pad >= 2 * batch_block:
        tb = batch_block
    else:
        # shrink the tile so mid-sized batches still get >=2 grid steps
        # (keeps both v7x TensorCores busy); tiny batches collapse to 1 step.
        tb = min(batch_block, max(_ALIGN, _round_up(pl.cdiv(B_pad, 2), _ALIGN)))
    B_final = _round_up(B_pad, tb)
    grid = (B_final // tb,)

    # ---- lane/batch padding of operands (zeros -> numerics unchanged) ----
    obs_p = jnp.pad(obs, ((0, B_final - B), (0, d_in_pad - d_in)))
    obs_p = obs_p.astype(jnp.bfloat16)            # bf16 obs stream (review item)

    w1 = jnp.pad(params["w1"].astype(jnp.bfloat16), ((0, d_in_pad - d_in), (0, 0)))
    w2 = params["w2"].astype(jnp.bfloat16)
    w3 = params["w3"].astype(jnp.bfloat16)
    w4 = params["w4"].astype(jnp.bfloat16)
    w5 = jnp.pad(params["w5"].astype(jnp.bfloat16), ((0, 0), (0, d_out_pad - d_out)))
    b1 = params["b1"].astype(jnp.float32)
    b2 = params["b2"].astype(jnp.float32)
    b3 = params["b3"].astype(jnp.float32)
    b4 = params["b4"].astype(jnp.float32)
    b5 = jnp.pad(params["b5"].astype(jnp.float32), ((0, 0), (0, d_out_pad - d_out)))

    act_lim = jnp.full((1, 1), act_limit, dtype=jnp.float32)

    vmem = pltpu.MemorySpace.VMEM
    smem = pltpu.MemorySpace.SMEM

    def full_spec(shape):
        # Whole array VMEM-resident; identical block index every grid step, so
        # Mosaic only DMAs it once.
        return pl.BlockSpec(shape, lambda i: tuple(0 for _ in shape),
                            memory_space=vmem)

    in_specs = [pl.BlockSpec(memory_space=smem)]                      # act_limit
    args = [act_lim]
    in_specs.append(pl.BlockSpec((tb, d_in_pad), lambda i: (i, 0),
                                 memory_space=vmem))                  # obs
    args.append(obs_p)
    for w, b in ((w1, b1), (w2, b2), (w3, b3), (w4, b4), (w5, b5)):
        in_specs.append(full_spec(w.shape))
        in_specs.append(full_spec(b.shape))
        args.append(w)
        args.append(b)

    out_spec = pl.BlockSpec((tb, d_out_pad), lambda i: (i, 0), memory_space=vmem)

    out = pl.pallas_call(
        _actor_kernel,
        out_shape=jax.ShapeDtypeStruct((B_final, d_out_pad), jnp.float32),
        grid_spec=pltpu.PrefetchScalarGridSpec(
            num_scalar_prefetch=0,
            grid=grid,
            in_specs=in_specs,
            out_specs=out_spec,
        ),
        compiler_params=pltpu.CompilerParams(
            dimension_semantics=("parallel",),
            vmem_limit_bytes=32 * 1024 * 1024,
        ),
    )(*args)

    return out[:B, :d_out]


def init_actor_params(key, d_input, d_output):
    """Deterministic init mimicking PyTorch nn.Linear default (U(+-1/sqrt(fan_in))).
    Weights stored bf16 (MXU inputs); biases stay f32 as (1, features) rows."""
    dims = [(d_input, HIDDEN), (HIDDEN, HIDDEN), (HIDDEN, HIDDEN),
            (HIDDEN, HIDDEN), (HIDDEN, d_output)]
    params = {}
    keys = jax.random.split(key, 2 * len(dims))
    for i, (fan_in, fan_out) in enumerate(dims):
        bound = 1.0 / jnp.sqrt(jnp.float32(fan_in))
        w = jax.random.uniform(keys[2 * i], (fan_in, fan_out),
                               minval=-bound, maxval=bound, dtype=jnp.float32)
        b = jax.random.uniform(keys[2 * i + 1], (1, fan_out),
                               minval=-bound, maxval=bound, dtype=jnp.float32)
        params[f"w{i + 1}"] = w.astype(jnp.bfloat16)
        params[f"b{i + 1}"] = b
    return params


def actor_reference(obs, params, act_limit):
    """Pure-JAX reference (f32 math; obs/weights quantized through bf16 like
    the kernel's MXU inputs; activations kept f32)."""
    h = obs.astype(jnp.bfloat16).astype(jnp.float32)
    for i in range(1, 5):
        w = params[f"w{i}"].astype(jnp.float32)
        h = jnp.maximum(h @ w + params[f"b{i}"], 0.0)
    w = params["w5"].astype(jnp.float32)
    y = jnp.tanh(h @ w + params["b5"])
    return y * act_limit


if __name__ == "__main__":
    key = jax.random.PRNGKey(0)
    k_obs, k_params, k_big = jax.random.split(key, 3)

    d_input = 32
    d_output = 8
    act_limit = 2.0
    params = init_actor_params(k_params, d_input, d_output)

    # Small batch: single grid step (tb=16 after alignment).
    batch = 8
    obs = jax.random.normal(k_obs, (batch, d_input), dtype=jnp.float32)
    out = jax.block_until_ready(actor_forward(obs, params, act_limit))
    ref = actor_reference(obs, params, act_limit)
    assert out.shape == (batch, d_output)
    assert jnp.allclose(out, ref, atol=3e-2, rtol=3e-2), "small-batch mismatch"

    # Non-multiple batch: exercises cdiv-padded grid with >=2 parallel steps.
    big_batch = 200
    obs_big = jax.random.normal(k_big, (big_batch, d_input), dtype=jnp.float32)
    out_big = jax.block_until_ready(actor_forward(obs_big, params, act_limit))
    ref_big = actor_reference(obs_big, params, act_limit)
    assert out_big.shape == (big_batch, d_output)
    assert jnp.allclose(out_big, ref_big, atol=3e-2, rtol=3e-2), "big-batch mismatch"

    # Explicit small tile: exercises the tb=batch_block branch (grid=(4,)).
    out_tiled = jax.block_until_ready(
        actor_forward(obs_big, params, act_limit, batch_block=64))
    assert out_tiled.shape == (big_batch, d_output)
    assert jnp.allclose(out_tiled, ref_big, atol=3e-2, rtol=3e-2), "tiled mismatch"

    print("KERNEL_OK")
</pallas_src>

<mosaic_0001>
module attributes {stable_mosaic.version = 11 : i64} {
  func.func @_actor_kernel(%arg0: i32, %arg1: memref<1x1xf32, #tpu.memory_space<smem>>, %arg2: memref<16x128xbf16, #tpu.memory_space<vmem>>, %arg3: memref<128x256xbf16, #tpu.memory_space<vmem>>, %arg4: memref<1x256xf32, #tpu.memory_space<vmem>>, %arg5: memref<256x256xbf16, #tpu.memory_space<vmem>>, %arg6: memref<1x256xf32, #tpu.memory_space<vmem>>, %arg7: memref<256x256xbf16, #tpu.memory_space<vmem>>, %arg8: memref<1x256xf32, #tpu.memory_space<vmem>>, %arg9: memref<256x256xbf16, #tpu.memory_space<vmem>>, %arg10: memref<1x256xf32, #tpu.memory_space<vmem>>, %arg11: memref<256x128xbf16, #tpu.memory_space<vmem>>, %arg12: memref<1x128xf32, #tpu.memory_space<vmem>>, %arg13: memref<16x128xf32, #tpu.memory_space<vmem>>) attributes {dimension_semantics = [#tpu.dimension_semantics<parallel>], iteration_bounds = array<i64: 1>, scalar_prefetch = 0 : i64, scratch_operands = 0 : i64, tpu.core_type = #tpu.core_type<tc>, window_params = [{transform_indices = @transform_0, window_bounds = array<i64: 1, 1>}, {transform_indices = @transform_1, window_bounds = array<i64: 16, 128>}, {pipeline_mode = #tpu.pipeline_mode<synchronous>, transform_indices = @transform_2, window_bounds = array<i64: 128, 256>}, {pipeline_mode = #tpu.pipeline_mode<synchronous>, transform_indices = @transform_3, window_bounds = array<i64: 1, 256>}, {pipeline_mode = #tpu.pipeline_mode<synchronous>, transform_indices = @transform_4, window_bounds = array<i64: 256, 256>}, {pipeline_mode = #tpu.pipeline_mode<synchronous>, transform_indices = @transform_5, window_bounds = array<i64: 1, 256>}, {pipeline_mode = #tpu.pipeline_mode<synchronous>, transform_indices = @transform_6, window_bounds = array<i64: 256, 256>}, {pipeline_mode = #tpu.pipeline_mode<synchronous>, transform_indices = @transform_7, window_bounds = array<i64: 1, 256>}, {pipeline_mode = #tpu.pipeline_mode<synchronous>, transform_indices = @transform_8, window_bounds = array<i64: 256, 256>}, {pipeline_mode = #tpu.pipeline_mode<synchronous>, transform_indices = @transform_9, window_bounds = array<i64: 1, 256>}, {pipeline_mode = #tpu.pipeline_mode<synchronous>, transform_indices = @transform_10, window_bounds = array<i64: 256, 128>}, {pipeline_mode = #tpu.pipeline_mode<synchronous>, transform_indices = @transform_11, window_bounds = array<i64: 1, 128>}, {transform_indices = @transform_12, window_bounds = array<i64: 16, 128>}]} {
    %c0 = arith.constant 0 : index
    %c0_0 = arith.constant 0 : index
    %0 = vector.load %arg2[%c0, %c0_0] : memref<16x128xbf16, #tpu.memory_space<vmem>>, vector<16x128xbf16>
    %c0_1 = arith.constant 0 : index
    %c0_2 = arith.constant 0 : index
    %1 = vector.load %arg3[%c0_1, %c0_2] : memref<128x256xbf16, #tpu.memory_space<vmem>>, vector<128x256xbf16>
    %cst = arith.constant dense<0.000000e+00> : vector<16x256xf32>
    %2 = tpu.matmul %0, %1, %cst {dimension_numbers = #tpu.dot_dimension_numbers<[1], [0], [0], [1], [0, 0, 1, 1], [], []>} : vector<16x128xbf16>, vector<128x256xbf16>, vector<16x256xf32> -> vector<16x256xf32>
    %c0_3 = arith.constant 0 : index
    %c0_4 = arith.constant 0 : index
    %3 = vector.load %arg4[%c0_3, %c0_4] : memref<1x256xf32, #tpu.memory_space<vmem>>, vector<1x256xf32>
    %4 = vector.broadcast %3 : vector<1x256xf32> to vector<16x256xf32>
    %5 = arith.addf %2, %4 : vector<16x256xf32>
    %cst_5 = arith.constant 0.000000e+00 : f32
    %6 = vector.broadcast %cst_5 : f32 to vector<16x256xf32>
    %7 = arith.maximumf %5, %6 : vector<16x256xf32>
    %8 = arith.truncf %7 : vector<16x256xf32> to vector<16x256xbf16>
    %c0_6 = arith.constant 0 : index
    %c0_7 = arith.constant 0 : index
    %9 = vector.load %arg5[%c0_6, %c0_7] : memref<256x256xbf16, #tpu.memory_space<vmem>>, vector<256x256xbf16>
    %cst_8 = arith.constant dense<0.000000e+00> : vector<16x256xf32>
    %10 = tpu.matmul %8, %9, %cst_8 {dimension_numbers = #tpu.dot_dimension_numbers<[1], [0], [0], [1], [0, 0, 1, 1], [], []>} : vector<16x256xbf16>, vector<256x256xbf16>, vector<16x256xf32> -> vector<16x256xf32>
    %c0_9 = arith.constant 0 : index
    %c0_10 = arith.constant 0 : index
    %11 = vector.load %arg6[%c0_9, %c0_10] : memref<1x256xf32, #tpu.memory_space<vmem>>, vector<1x256xf32>
    %12 = vector.broadcast %11 : vector<1x256xf32> to vector<16x256xf32>
    %13 = arith.addf %10, %12 : vector<16x256xf32>
    %cst_11 = arith.constant 0.000000e+00 : f32
    %14 = vector.broadcast %cst_11 : f32 to vector<16x256xf32>
    %15 = arith.maximumf %13, %14 : vector<16x256xf32>
    %16 = arith.truncf %15 : vector<16x256xf32> to vector<16x256xbf16>
    %c0_12 = arith.constant 0 : index
    %c0_13 = arith.constant 0 : index
    %17 = vector.load %arg7[%c0_12, %c0_13] : memref<256x256xbf16, #tpu.memory_space<vmem>>, vector<256x256xbf16>
    %cst_14 = arith.constant dense<0.000000e+00> : vector<16x256xf32>
    %18 = tpu.matmul %16, %17, %cst_14 {dimension_numbers = #tpu.dot_dimension_numbers<[1], [0], [0], [1], [0, 0, 1, 1], [], []>} : vector<16x256xbf16>, vector<256x256xbf16>, vector<16x256xf32> -> vector<16x256xf32>
    %c0_15 = arith.constant 0 : index
    %c0_16 = arith.constant 0 : index
    %19 = vector.load %arg8[%c0_15, %c0_16] : memref<1x256xf32, #tpu.memory_space<vmem>>, vector<1x256xf32>
    %20 = vector.broadcast %19 : vector<1x256xf32> to vector<16x256xf32>
    %21 = arith.addf %18, %20 : vector<16x256xf32>
    %cst_17 = arith.constant 0.000000e+00 : f32
    %22 = vector.broadcast %cst_17 : f32 to vector<16x256xf32>
    %23 = arith.maximumf %21, %22 : vector<16x256xf32>
    %24 = arith.truncf %23 : vector<16x256xf32> to vector<16x256xbf16>
    %c0_18 = arith.constant 0 : index
    %c0_19 = arith.constant 0 : index
    %25 = vector.load %arg9[%c0_18, %c0_19] : memref<256x256xbf16, #tpu.memory_space<vmem>>, vector<256x256xbf16>
    %cst_20 = arith.constant dense<0.000000e+00> : vector<16x256xf32>
    %26 = tpu.matmul %24, %25, %cst_20 {dimension_numbers = #tpu.dot_dimension_numbers<[1], [0], [0], [1], [0, 0, 1, 1], [], []>} : vector<16x256xbf16>, vector<256x256xbf16>, vector<16x256xf32> -> vector<16x256xf32>
    %c0_21 = arith.constant 0 : index
    %c0_22 = arith.constant 0 : index
    %27 = vector.load %arg10[%c0_21, %c0_22] : memref<1x256xf32, #tpu.memory_space<vmem>>, vector<1x256xf32>
    %28 = vector.broadcast %27 : vector<1x256xf32> to vector<16x256xf32>
    %29 = arith.addf %26, %28 : vector<16x256xf32>
    %cst_23 = arith.constant 0.000000e+00 : f32
    %30 = vector.broadcast %cst_23 : f32 to vector<16x256xf32>
    %31 = arith.maximumf %29, %30 : vector<16x256xf32>
    %32 = arith.truncf %31 : vector<16x256xf32> to vector<16x256xbf16>
    %c0_24 = arith.constant 0 : index
    %c0_25 = arith.constant 0 : index
    %33 = vector.load %arg11[%c0_24, %c0_25] : memref<256x128xbf16, #tpu.memory_space<vmem>>, vector<256x128xbf16>
    %cst_26 = arith.constant dense<0.000000e+00> : vector<16x128xf32>
    %34 = tpu.matmul %32, %33, %cst_26 {dimension_numbers = #tpu.dot_dimension_numbers<[1], [0], [0], [1], [0, 0, 1, 1], [], []>} : vector<16x256xbf16>, vector<256x128xbf16>, vector<16x128xf32> -> vector<16x128xf32>
    %c0_27 = arith.constant 0 : index
    %c0_28 = arith.constant 0 : index
    %35 = vector.load %arg12[%c0_27, %c0_28] : memref<1x128xf32, #tpu.memory_space<vmem>>, vector<1x128xf32>
    %36 = vector.broadcast %35 : vector<1x128xf32> to vector<16x128xf32>
    %37 = arith.addf %34, %36 : vector<16x128xf32>
    %c0_29 = arith.constant 0 : index
    %c0_30 = arith.constant 0 : index
    %38 = memref.load %arg1[%c0_29, %c0_30] : memref<1x1xf32, #tpu.memory_space<smem>>
    %39 = math.tanh %37 : vector<16x128xf32>
    %40 = vector.broadcast %38 : f32 to vector<16x128xf32>
    %41 = arith.mulf %39, %40 : vector<16x128xf32>
    %c0_31 = arith.constant 0 : index
    %c0_32 = arith.constant 0 : index
    %42 = vector.load %arg13[%c0_31, %c0_32] : memref<16x128xf32, #tpu.memory_space<vmem>>, vector<16x128xf32>
    tpu.vector_store %arg13[%c0_31, %c0_32], %41 {strides = array<i32>} : memref<16x128xf32, #tpu.memory_space<vmem>>, vector<16x128xf32>,
    return
  }
  func.func @transform_0(%arg0: i32) -> (i32, i32) {
    %c0_i32 = arith.constant 0 : i32
    %c0_i32_0 = arith.constant 0 : i32
    %c0_i32_1 = arith.constant 0 : i32
    return %c0_i32, %c0_i32_0 : i32, i32
  }
  func.func @transform_1(%arg0: i32) -> (i32, i32) {
    %c0_i32 = arith.constant 0 : i32
    %c0_i32_0 = arith.constant 0 : i32
    return %arg0, %c0_i32 : i32, i32
  }
  func.func @transform_2(%arg0: i32) -> (i32, i32) {
    %c0_i32 = arith.constant 0 : i32
    %c0_i32_0 = arith.constant 0 : i32
    %c0_i32_1 = arith.constant 0 : i32
    return %c0_i32, %c0_i32_0 : i32, i32
  }
  func.func @transform_3(%arg0: i32) -> (i32, i32) {
    %c0_i32 = arith.constant 0 : i32
    %c0_i32_0 = arith.constant 0 : i32
    %c0_i32_1 = arith.constant 0 : i32
    return %c0_i32, %c0_i32_0 : i32, i32
  }
  func.func @transform_4(%arg0: i32) -> (i32, i32) {
    %c0_i32 = arith.constant 0 : i32
    %c0_i32_0 = arith.constant 0 : i32
    %c0_i32_1 = arith.constant 0 : i32
    return %c0_i32, %c0_i32_0 : i32, i32
  }
  func.func @transform_5(%arg0: i32) -> (i32, i32) {
    %c0_i32 = arith.constant 0 : i32
    %c0_i32_0 = arith.constant 0 : i32
    %c0_i32_1 = arith.constant 0 : i32
    return %c0_i32, %c0_i32_0 : i32, i32
  }
  func.func @transform_6(%arg0: i32) -> (i32, i32) {
    %c0_i32 = arith.constant 0 : i32
    %c0_i32_0 = arith.constant 0 : i32
    %c0_i32_1 = arith.constant 0 : i32
    return %c0_i32, %c0_i32_0 : i32, i32
  }
  func.func @transform_7(%arg0: i32) -> (i32, i32) {
    %c0_i32 = arith.constant 0 : i32
    %c0_i32_0 = arith.constant 0 : i32
    %c0_i32_1 = arith.constant 0 : i32
    return %c0_i32, %c0_i32_0 : i32, i32
  }
  func.func @transform_8(%arg0: i32) -> (i32, i32) {
    %c0_i32 = arith.constant 0 : i32
    %c0_i32_0 = arith.constant 0 : i32
    %c0_i32_1 = arith.constant 0 : i32
    return %c0_i32, %c0_i32_0 : i32, i32
  }
  func.func @transform_9(%arg0: i32) -> (i32, i32) {
    %c0_i32 = arith.constant 0 : i32
    %c0_i32_0 = arith.constant 0 : i32
    %c0_i32_1 = arith.constant 0 : i32
    return %c0_i32, %c0_i32_0 : i32, i32
  }
  func.func @transform_10(%arg0: i32) -> (i32, i32) {
    %c0_i32 = arith.constant 0 : i32
    %c0_i32_0 = arith.constant 0 : i32
    %c0_i32_1 = arith.constant 0 : i32
    return %c0_i32, %c0_i32_0 : i32, i32
  }
  func.func @transform_11(%arg0: i32) -> (i32, i32) {
    %c0_i32 = arith.constant 0 : i32
    %c0_i32_0 = arith.constant 0 : i32
    %c0_i32_1 = arith.constant 0 : i32
    return %c0_i32, %c0_i32_0 : i32, i32
  }
  func.func @transform_12(%arg0: i32) -> (i32, i32) {
    %c0_i32 = arith.constant 0 : i32
    %c0_i32_0 = arith.constant 0 : i32
    return %arg0, %c0_i32 : i32, i32
  }
}

</mosaic_0001>

<bundles_post_ra>
// kernel: tpu_custom_call.1
= control target key start
LH: loop header
LB: loop body
LE: loop exit
PB: predicated region body
PF: predicated region fallthrough
CT: control target
= control target key end

     0   :  { %18 = vsyncpa [#allocation4], 0  ;;  %s1983_s0 = inlined_call_operand.<no memory space> [shape: f32[1,1], index: 0, kind: input, shape index: {}]   ;;  %s1984_s1 = inlined_call_operand.hbm [shape: bf16[16,128], index: 1, kind: input, shape index: {}]   ;;  %s1985_s2 = inlined_call_operand.hbm [shape: bf16[128,256], index: 2, kind: input, shape index: {}]   ;;  %s1986_s3 = inlined_call_operand.vmem [shape: f32[1,256], index: 3, kind: input, shape index: {}]   ;;  %s1987_s4 = inlined_call_operand.hbm [shape: bf16[256,256], index: 4, kind: input, shape index: {}]   ;;  %s1988_s5 = inlined_call_operand.vmem [shape: f32[1,256], index: 5, kind: input, shape index: {}]   ;;  %s1989_s6 = inlined_call_operand.hbm [shape: bf16[256,256], index: 6, kind: input, shape index: {}]   ;;  %s1990_s7 = inlined_call_operand.vmem [shape: f32[1,256], index: 7, kind: input, shape index: {}]   ;;  %s1991_s8 = inlined_call_operand.hbm [shape: bf16[256,256], index: 8, kind: input, shape index: {}]   ;;  %s1992_s9 = inlined_call_operand.vmem [shape: f32[1,256], index: 9, kind: input, shape index: {}]   ;;  %s1993_s10 = inlined_call_operand.hbm [shape: bf16[256,128], index: 10, kind: input, shape index: {}]   ;;  %s1994_s11 = inlined_call_operand.vmem [shape: f32[1,128], index: 11, kind: input, shape index: {}]   ;;  %s1995_s12 = inlined_call_operand.hbm [shape: f32[16,128], index: 12, kind: output, shape index: {}]  }
   0x1   :  { %19 = vsyncpa [#allocation7], 0 }
   0x2   :  { %20 = vsyncpa [#allocation10], 0 }
   0x3   :  { %21 = vsyncpa [#allocation13], 0 }
   0x4   :  { %22 = vsyncpa [#allocation5], 0  ;;  %s1771_s21 = smov [#allocation6]   ;;  %s1607_s25 = scalar_lea.hbm %s1985_s2, 2048 }
   0x5   :  { %s42_s22 = sshll.u32 %s1771_s21, 4  ;;  %p1608_p0 = scmp.ne.s32.totalorder %s1985_s2, %s1607_s25  ;;  %s43_s22 = int_to_ptr.vmem [resolvable:$true] %s42_s22 }
   0x6   :  { %p1611_p1 = scmp.lt.u32.totalorder %s1607_s25, %s1985_s2 }
   0x8   :  { %p1613_p2 = pnand %p1611_p1, %p1608_p0 }
   0xa   :  { %1616 = shalt.err (!%p1613_p2)
}
   0xb   :  { %s1617_s30 = scalar_lea.vmem %s43_s22, 2048  ;;  %p1622_p4 = scmp.lt.s32.totalorder %s43_s22, %s43_s22 }
   0xc   :  { %p1618_p3 = scmp.ne.s32.totalorder %s43_s22, %s1617_s30  ;;  %p1623_p5 = scmp.lt.s32.totalorder %s1617_s30, %s1617_s30 }
   0xe   :  { %p1624_p6 = por %p1623_p5, %p1622_p4 }
  0x10   :  { %p1625_p7 = pnand %p1624_p6, %p1618_p3 }
  0x12   :  { %1628 = shalt.err (!%p1625_p7)
}
  0x13   :  { %s1772_s13 = smov 128   ;;  %s1773_s14 = smov 8  }
  0x14   :  { %48 = dma.hbm_to_vmem [thread:$0]  %s1985_s2, 2048, %s43_s22, [#allocation7], %s1772_s13, %s1772_s13, %s1773_s14  }
  0x15   :  { %s1774_s17 = smov [#allocation9]   ;;  %s1775_s19 = smov [#allocation3]  }
  0x16   :  { %s70_s18 = sshll.u32 %s1774_s17, 4  ;;  %s30_s20 = sshll.u32 %s1775_s19, 4  ;;  %s71_s18 = int_to_ptr.vmem [resolvable:$true] %s70_s18  ;;  %s31_s20 = int_to_ptr.vmem [resolvable:$true] %s30_s20 }
  0x17   :  { %s1629_s24 = scalar_lea.hbm %s1989_s6, 4096 }
  0x18   :  { %p1630_p8 = scmp.ne.s32.totalorder %s1989_s6, %s1629_s24  ;;  %p1633_p9 = scmp.lt.u32.totalorder %s1629_s24, %s1989_s6 }
  0x1a   :  { %p1635_p10 = pnand %p1633_p9, %p1630_p8 }
  0x1c   :  { %1638 = shalt.err (!%p1635_p10)
}
  0x1d   :  { %s1639_s2 = scalar_lea.vmem %s71_s18, 4096  ;;  %p1644_p12 = scmp.lt.s32.totalorder %s71_s18, %s71_s18 }
  0x1e   :  { %p1640_p11 = scmp.ne.s32.totalorder %s71_s18, %s1639_s2  ;;  %p1645_p13 = scmp.lt.s32.totalorder %s1639_s2, %s1639_s2 }
  0x20   :  { %p1646_p0 = por %p1645_p13, %p1644_p12 }
  0x22   :  { %p1647_p1 = pnand %p1646_p0, %p1640_p11 }
  0x24   :  { %1650 = shalt.err (!%p1647_p1)
}
  0x25   :  { %76 = dma.hbm_to_vmem [thread:$0]  %s1989_s6, 4096, %s71_s18, [#allocation10], %s1772_s13, %s1772_s13, %s1773_s14  }
  0x26   :  { %s1651_s16 = scalar_lea.hbm %s1984_s1, 128 }
  0x27   :  { %p1652_p2 = scmp.ne.s32.totalorder %s1984_s1, %s1651_s16  ;;  %p1655_p3 = scmp.lt.u32.totalorder %s1651_s16, %s1984_s1 }
  0x29   :  { %p1657_p4 = pnand %p1655_p3, %p1652_p2 }
  0x2b   :  { %1660 = shalt.err (!%p1657_p4)
}
  0x2c   :  { %s1661_s24 = scalar_lea.vmem %s31_s20, 128  ;;  %p1666_p6 = scmp.lt.s32.totalorder %s31_s20, %s31_s20 }
  0x2d   :  { %p1662_p5 = scmp.ne.s32.totalorder %s31_s20, %s1661_s24  ;;  %p1667_p7 = scmp.lt.s32.totalorder %s1661_s24, %s1661_s24 }
  0x2f   :  { %p1668_p8 = por %p1667_p7, %p1666_p6 }
  0x31   :  { %p1669_p9 = pnand %p1668_p8, %p1662_p5 }
  0x33   :  { %1672 = shalt.err (!%p1669_p9)
}
  0x34   :  { %s1776_s6 = smov 64   ;;  %s1777_s18 = smov 4  }
  0x35   :  { %36 = dma.hbm_to_vmem [thread:$0]  %s1984_s1, 128, %s31_s20, [#allocation4], %s1776_s6, %s1776_s6, %s1777_s18  }
  0x36   :  { %s1778_s27 = smov [#allocation8]   ;;  %s1779_s2 = smov [#allocation11]  }
  0x37   :  { %s56_s28 = sshll.u32 %s1778_s27, 4  ;;  %s84_s22 = sshll.u32 %s1779_s2, 4  ;;  %s57_s28 = int_to_ptr.vmem [resolvable:$true] %s56_s28  ;;  %s85_s22 = int_to_ptr.vmem [resolvable:$true] %s84_s22 }
  0x38   :  { %s1673_s15 = scalar_lea.hbm %s1987_s4, 4096 }
  0x39   :  { %p1674_p10 = scmp.ne.s32.totalorder %s1987_s4, %s1673_s15  ;;  %p1677_p11 = scmp.lt.u32.totalorder %s1673_s15, %s1987_s4 }
  0x3b   :  { %p1679_p12 = pnand %p1677_p11, %p1674_p10 }
  0x3d   :  { %1682 = shalt.err (!%p1679_p12)
}
  0x3e   :  { %s1683_s1 = scalar_lea.vmem %s57_s28, 4096  ;;  %p1688_p0 = scmp.lt.s32.totalorder %s57_s28, %s57_s28 }
  0x3f   :  { %p1684_p13 = scmp.ne.s32.totalorder %s57_s28, %s1683_s1  ;;  %p1689_p1 = scmp.lt.s32.totalorder %s1683_s1, %s1683_s1 }
  0x41   :  { %p1690_p2 = por %p1689_p1, %p1688_p0 }
  0x43   :  { %p1691_p3 = pnand %p1690_p2, %p1684_p13 }
  0x45   :  { %1694 = shalt.err (!%p1691_p3)
}
  0x46   :  { %62 = dma.hbm_to_vmem [thread:$0]  %s1987_s4, 4096, %s57_s28, [#allocation7], %s1772_s13, %s1772_s13, %s1773_s14  }
  0x47   :  { %s1695_s26 = scalar_lea.hbm %s1991_s8, 4096 }
  0x48   :  { %p1696_p4 = scmp.ne.s32.totalorder %s1991_s8, %s1695_s26  ;;  %p1699_p5 = scmp.lt.u32.totalorder %s1695_s26, %s1991_s8 }
  0x4a   :  { %p1701_p6 = pnand %p1699_p5, %p1696_p4 }
  0x4c   :  { %1704 = shalt.err (!%p1701_p6)
}
  0x4d   :  { %s1705_s15 = scalar_lea.vmem %s85_s22, 4096  ;;  %p1710_p8 = scmp.lt.s32.totalorder %s85_s22, %s85_s22 }
  0x4e   :  { %p1706_p7 = scmp.ne.s32.totalorder %s85_s22, %s1705_s15  ;;  %p1711_p9 = scmp.lt.s32.totalorder %s1705_s15, %s1705_s15 }
  0x50   :  { %p1712_p10 = por %p1711_p9, %p1710_p8 }
  0x52   :  { %p1713_p11 = pnand %p1712_p10, %p1706_p7 }
  0x54   :  { %1716 = shalt.err (!%p1713_p11)
}
  0x55   :  { %90 = dma.hbm_to_vmem [thread:$0]  %s1991_s8, 4096, %s85_s22, [#allocation10], %s1772_s13, %s1772_s13, %s1773_s14  }
  0x56   :  { %s1780_s16 = smov [#allocation12]   ;;  %s1717_s1 = scalar_lea.hbm %s1993_s10, 2048 }
  0x57   :  { %s98_s17 = sshll.u32 %s1780_s16, 4  ;;  %p1718_p12 = scmp.ne.s32.totalorder %s1993_s10, %s1717_s1  ;;  %s99_s17 = int_to_ptr.vmem [resolvable:$true] %s98_s17 }
  0x58   :  { %p1721_p13 = scmp.lt.u32.totalorder %s1717_s1, %s1993_s10 }
  0x5a   :  { %p1723_p0 = pnand %p1721_p13, %p1718_p12 }
  0x5c   :  { %1726 = shalt.err (!%p1723_p0)
}
  0x5d   :  { %s1727_s26 = scalar_lea.vmem %s99_s17, 2048  ;;  %p1732_p2 = scmp.lt.s32.totalorder %s99_s17, %s99_s17 }
  0x5e   :  { %p1728_p1 = scmp.ne.s32.totalorder %s99_s17, %s1727_s26  ;;  %p1733_p3 = scmp.lt.s32.totalorder %s1727_s26, %s1727_s26 }
  0x60   :  { %p1734_p4 = por %p1733_p3, %p1732_p2 }
  0x62   :  { %p1735_p5 = pnand %p1734_p4, %p1728_p1 }
  0x64   :  { %1738 = shalt.err (!%p1735_p5)
}
  0x65   :  { %104 = dma.hbm_to_vmem [thread:$0]  %s1993_s10, 2048, %s99_s17, [#allocation13], %s1776_s6, %s1776_s6, %s1777_s18  }
  0x66   :  { %1761 = dma.done.wait [#allocation4], 128  }
  0x67   :  { %1762 = vsyncadd [#allocation4], 4294967168 }
  0x68   :  { %1763 = dma.done.wait [#allocation7], 6144  }
  0x69   :  { %1764 = vsyncadd [#allocation7], 4294961152 }
  0x6a   :  { %1765 = dma.done.wait [#allocation10], 8192  }
  0x6b   :  { %1766 = vsyncadd [#allocation10], 4294959104 }
  0x6c   :  { %1767 = dma.done.wait [#allocation13], 2048  }
  0x6d   :  { %1768 = vsyncadd [#allocation13], 4294965248  ;;  %v1781_v0 = vmov 0   ;;  %v1418_v1 = vld [vmem:[#allocation6 + $0x4] ss:$8 sps:$4 sm:$0xff]   ;;  %v1442_v27 = vld [vmem:[#allocation3] sm:$0xff]  }
  0x6e   :  { %274 = vmatprep.mubr.bf16.mxu0 %v1781_v0  ;;  %v1420_v2 = vld [vmem:[#allocation6] ss:$8 sps:$4 sm:$0xff]   ;;  %242 = vmatprep.subr.bf16.mxu0 %v1418_v1  ;;  %v1421_v3 = vld [vmem:[#allocation6 + $0x14] ss:$8 sps:$4 sm:$0xff]   ;;  %v1423_v4 = vld [vmem:[#allocation6 + $0x10] ss:$8 sps:$4 sm:$0xff]  }
  0x6f   :  { %243 = vmatpush1.bf16.msra.mxu0 %v1420_v2  ;;  %v1424_v5 = vld [vmem:[#allocation6 + $0x24] ss:$8 sps:$4 sm:$0xff]   ;;  %v1426_v6 = vld [vmem:[#allocation6 + $0x20] ss:$8 sps:$4 sm:$0xff]   ;;  %v1427_v7 = vld [vmem:[#allocation6 + $0x34] ss:$8 sps:$4 sm:$0xff]  }
  0x70   :  { %244 = vmatprep.subr.bf16.mxu0 %v1421_v3  ;;  %v1429_v8 = vld [vmem:[#allocation6 + $0x30] ss:$8 sps:$4 sm:$0xff]   ;;  %v1430_v9 = vld [vmem:[#allocation6 + $0x44] ss:$8 sps:$4 sm:$0xff]   ;;  %v1445_v11 = vld [vmem:[#allocation8] ss:$8 sps:$4 sm:$0xff]  }
  0x71   :  { %v1443_v10 = vld [vmem:[#allocation8 + $0x4] ss:$8 sps:$4 sm:$0xff]   ;;  %v1446_v12 = vld [vmem:[#allocation8 + $0x14] ss:$8 sps:$4 sm:$0xff]   ;;  %v1432_v13 = vld [vmem:[#allocation6 + $0x40] ss:$8 sps:$4 sm:$0xff]  }
  0x72   :  { %495 = vmatprep.subr.bf16.mxu1 %v1443_v10  ;;  %v1448_v14 = vld [vmem:[#allocation8 + $0x10] ss:$8 sps:$4 sm:$0xff]   ;;  %v1433_v15 = vld [vmem:[#allocation6 + $0x54] ss:$8 sps:$4 sm:$0xff]   ;;  %v1449_v16 = vld [vmem:[#allocation8 + $0x24] ss:$8 sps:$4 sm:$0xff]  }
  0x73   :  { %245 = vmatpush1.bf16.msra.mxu0 %v1423_v4  ;;  %496 = vmatpush1.bf16.msra.mxu1 %v1445_v11  ;;  %v1435_v17 = vld [vmem:[#allocation6 + $0x50] ss:$8 sps:$4 sm:$0xff]   ;;  %v1451_v18 = vld [vmem:[#allocation8 + $0x20] ss:$8 sps:$4 sm:$0xff]   ;;  %v1436_v19 = vld [vmem:[#allocation6 + $0x64] ss:$8 sps:$4 sm:$0xff]  }
  0x74   :  { %246 = vmatprep.subr.bf16.mxu0 %v1424_v5  ;;  %497 = vmatprep.subr.bf16.mxu1 %v1446_v12  ;;  %v1452_v20 = vld [vmem:[#allocation8 + $0x34] ss:$8 sps:$4 sm:$0xff]   ;;  %v1438_v21 = vld [vmem:[#allocation6 + $0x60] ss:$8 sps:$4 sm:$0xff]   ;;  %v1454_v22 = vld [vmem:[#allocation8 + $0x30] ss:$8 sps:$4 sm:$0xff]  }
  0x75   :  { %v1439_v23 = vld [vmem:[#allocation6 + $0x74] ss:$8 sps:$4 sm:$0xff]   ;;  %v1455_v24 = vld [vmem:[#allocation8 + $0x44] ss:$8 sps:$4 sm:$0xff]   ;;  %v1441_v25 = vld [vmem:[#allocation6 + $0x70] ss:$8 sps:$4 sm:$0xff]  }
  0x76   :  { %v1457_v26 = vld [vmem:[#allocation8 + $0x40] ss:$8 sps:$4 sm:$0xff]   ;;  %v1458_v28 = vld [vmem:[#allocation8 + $0x54] ss:$8 sps:$4 sm:$0xff]   ;;  %v1460_v29 = vld [vmem:[#allocation8 + $0x50] ss:$8 sps:$4 sm:$0xff]  }
  0x77   :  { %247 = vmatpush1.bf16.msra.mxu0 %v1426_v6  ;;  %498 = vmatpush1.bf16.msra.mxu1 %v1448_v14  ;;  %v1461_v30 = vld [vmem:[#allocation8 + $0x64] ss:$8 sps:$4 sm:$0xff]   ;;  %v1463_v31 = vld [vmem:[#allocation8 + $0x60] ss:$8 sps:$4 sm:$0xff]   ;;  %v1464_v32 = vld [vmem:[#allocation8 + $0x74] ss:$8 sps:$4 sm:$0xff]   ;;  %v146_v14 = vlaneseq }
  0x78   :  { %248 = vmatprep.subr.bf16.mxu0 %v1427_v7  ;;  %499 = vmatprep.subr.bf16.mxu1 %v1449_v16  ;;  %v1466_v33 = vld [vmem:[#allocation8 + $0x70] ss:$8 sps:$4 sm:$0xff]   ;;  %v1467_v34 = vld [vmem:[#allocation8 + $0x84] ss:$8 sps:$4 sm:$0xff]   ;;  %v1469_v35 = vld [vmem:[#allocation8 + $0x80] ss:$8 sps:$4 sm:$0xff]  }
  0x79   :  { %v1470_v36 = vld [vmem:[#allocation8 + $0x94] ss:$8 sps:$4 sm:$0xff]   ;;  %v1472_v37 = vld [vmem:[#allocation8 + $0x90] ss:$8 sps:$4 sm:$0xff]   ;;  %v1473_v38 = vld [vmem:[#allocation8 + $0xa4] ss:$8 sps:$4 sm:$0xff]  }
  0x7a   :  { %v1475_v39 = vld [vmem:[#allocation8 + $0xa0] ss:$8 sps:$4 sm:$0xff]   ;;  %v1476_v40 = vld [vmem:[#allocation8 + $0xb4] ss:$8 sps:$4 sm:$0xff]   ;;  %v1478_v41 = vld [vmem:[#allocation8 + $0xb0] ss:$8 sps:$4 sm:$0xff]  }
  0x7b   :  { %249 = vmatpush1.bf16.msra.mxu0 %v1429_v8  ;;  %500 = vmatpush1.bf16.msra.mxu1 %v1451_v18  ;;  %v1479_v42 = vld [vmem:[#allocation8 + $0xc4] ss:$8 sps:$4 sm:$0xff]   ;;  %v1481_v43 = vld [vmem:[#allocation8 + $0xc0] ss:$8 sps:$4 sm:$0xff]   ;;  %v1482_v44 = vld [vmem:[#allocation8 + $0xd4] ss:$8 sps:$4 sm:$0xff]  }
  0x7c   :  { %250 = vmatprep.subr.bf16.mxu0 %v1430_v9  ;;  %501 = vmatprep.subr.bf16.mxu1 %v1452_v20  ;;  %v1484_v45 = vld [vmem:[#allocation8 + $0xd0] ss:$8 sps:$4 sm:$0xff]   ;;  %v1485_v46 = vld [vmem:[#allocation8 + $0xe4] ss:$8 sps:$4 sm:$0xff]   ;;  %v1487_v47 = vld [vmem:[#allocation8 + $0xe0] ss:$8 sps:$4 sm:$0xff]  }
  0x7d   :  { %v1488_v48 = vld [vmem:[#allocation8 + $0xf4] ss:$8 sps:$4 sm:$0xff]   ;;  %v1490_v49 = vld [vmem:[#allocation8 + $0xf0] ss:$8 sps:$4 sm:$0xff]   ;;  %v1491_v50 = vld [vmem:[#allocation9] ss:$8 sps:$4 sm:$0xff]  }
  0x7e   :  { %v1493_v51 = vld [vmem:[#allocation9 + $0x4] ss:$8 sps:$4 sm:$0xff]   ;;  %v1496_v52 = vld [vmem:[#allocation9 + $0x14] ss:$8 sps:$4 sm:$0xff]   ;;  %v1494_v53 = vld [vmem:[#allocation9 + $0x10] ss:$8 sps:$4 sm:$0xff]  }
  0x7f   :  { %251 = vmatpush1.bf16.msra.mxu0 %v1432_v13  ;;  %502 = vmatpush1.bf16.msra.mxu1 %v1454_v22  ;;  %v1499_v54 = vld [vmem:[#allocation9 + $0x24] ss:$8 sps:$4 sm:$0xff]   ;;  %v1497_v55 = vld [vmem:[#allocation9 + $0x20] ss:$8 sps:$4 sm:$0xff]   ;;  %v1502_v56 = vld [vmem:[#allocation9 + $0x34] ss:$8 sps:$4 sm:$0xff]  }
  0x80   :  { %252 = vmatprep.subr.bf16.mxu0 %v1433_v15  ;;  %503 = vmatprep.subr.bf16.mxu1 %v1455_v24  ;;  %v1500_v57 = vld [vmem:[#allocation9 + $0x30] ss:$8 sps:$4 sm:$0xff]   ;;  %v1505_v58 = vld [vmem:[#allocation9 + $0x44] ss:$8 sps:$4 sm:$0xff]   ;;  %v1503_v59 = vld [vmem:[#allocation9 + $0x40] ss:$8 sps:$4 sm:$0xff]  }
  0x81   :  { %v1508_v60 = vld [vmem:[#allocation9 + $0x54] ss:$8 sps:$4 sm:$0xff]   ;;  %v1506_v61 = vld [vmem:[#allocation9 + $0x50] ss:$8 sps:$4 sm:$0xff]   ;;  %v1511_v62 = vld [vmem:[#allocation9 + $0x64] ss:$8 sps:$4 sm:$0xff]  }
  0x82   :  { %v1509_v63 = vld [vmem:[#allocation9 + $0x60] ss:$8 sps:$4 sm:$0xff]   ;;  %v1514_v0 = vld [vmem:[#allocation9 + $0x74] ss:$8 sps:$4 sm:$0xff]   ;;  %v1512_v1 = vld [vmem:[#allocation9 + $0x70] ss:$8 sps:$4 sm:$0xff]  }
  0x83   :  { %253 = vmatpush1.bf16.msra.mxu0 %v1435_v17  ;;  %504 = vmatpush1.bf16.msra.mxu1 %v1457_v26  ;;  %v1517_v2 = vld [vmem:[#allocation9 + $0x84] ss:$8 sps:$4 sm:$0xff]   ;;  %v1515_v3 = vld [vmem:[#allocation9 + $0x80] ss:$8 sps:$4 sm:$0xff]   ;;  %v1520_v4 = vld [vmem:[#allocation9 + $0x94] ss:$8 sps:$4 sm:$0xff]  }
  0x84   :  { %254 = vmatprep.subr.bf16.mxu0 %v1436_v19  ;;  %505 = vmatprep.subr.bf16.mxu1 %v1458_v28  ;;  %v1518_v5 = vld [vmem:[#allocation9 + $0x90] ss:$8 sps:$4 sm:$0xff]   ;;  %v1523_v6 = vld [vmem:[#allocation9 + $0xa4] ss:$8 sps:$4 sm:$0xff]   ;;  %v1521_v7 = vld [vmem:[#allocation9 + $0xa0] ss:$8 sps:$4 sm:$0xff]  }
  0x85   :  { %v1526_v8 = vld [vmem:[#allocation9 + $0xb4] ss:$8 sps:$4 sm:$0xff]   ;;  %v1524_v9 = vld [vmem:[#allocation9 + $0xb0] ss:$8 sps:$4 sm:$0xff]   ;;  %v1529_v10 = vld [vmem:[#allocation9 + $0xc4] ss:$8 sps:$4 sm:$0xff]  }
  0x86   :  { %v1527_v11 = vld [vmem:[#allocation9 + $0xc0] ss:$8 sps:$4 sm:$0xff]   ;;  %v1532_v12 = vld [vmem:[#allocation9 + $0xd4] ss:$8 sps:$4 sm:$0xff]   ;;  %v1530_v13 = vld [vmem:[#allocation9 + $0xd0] ss:$8 sps:$4 sm:$0xff]  }
  0x87   :  { %255 = vmatpush1.bf16.msra.mxu0 %v1438_v21  ;;  %506 = vmatpush1.bf16.msra.mxu1 %v1460_v29  ;;  %v147_v15 = vshrl.u32 %v146_v14, 7  ;;  %v144_v17 = vld [vmem:[%s1986_s3] sm:$0x3]  ;;  %s1782_s4 = smov [#allocation14]  }
  0x88   :  { %256 = vmatprep.subr.bf16.mxu0 %v1439_v23  ;;  %507 = vmatprep.subr.bf16.mxu1 %v1461_v30  ;;  %s1239_s28 = sshll.u32 %s1782_s4, 4  ;;  %s1240_s28 = int_to_ptr.vmem [resolvable:$true] %s1239_s28 }
  0x89   :  { %v1938_v16 = vsub.s32 0, %v147_v15  ;;  %v1943_v18 = vsub.s32 1, %v147_v15  ;;  %p1744_p7 = scmp.lt.s32.totalorder %s1240_s28, %s1240_s28 }
  0x8b   :  { %257 = vmatpush1.bf16.msra.mxu0 %v1441_v25  ;;  %508 = vmatpush1.bf16.msra.mxu1 %v1463_v31  ;;  %v149_v19 = vrot.slane %v144_v17, %v1938_v16  ;;  %v153_v20 = vrot.slane %v144_v17, %v1943_v18 }
  0x8c   :  { %509 = vmatprep.subr.bf16.mxu1 %v1464_v32  ;;  %748 = vmatprep.subr.bf16.mxu0 %v1493_v51  ;;  %v1559_v51 = vld [vmem:[#allocation11 + $0x64] ss:$8 sps:$4 sm:$0xff]  }
  0x8e   :  { %275 = vmatmul.mubr.bf16.vlgmr.msra.gmra.mrb[0].mxu0 %v1442_v27 }
  0x8f   :  { %510 = vmatpush1.bf16.msra.mxu1 %v1466_v33  ;;  %749 = vmatpush1.bf16.msra.mxu0 %v1491_v50  ;;  %v1554_v50 = vld [vmem:[#allocation11 + $0x50] ss:$8 sps:$4 sm:$0xff]  }
  0x90   :  { %511 = vmatprep.subr.bf16.mxu1 %v1467_v34  ;;  %750 = vmatprep.subr.bf16.mxu0 %v1496_v52  ;;  %v1557_v52 = vld [vmem:[#allocation11 + $0x60] ss:$8 sps:$4 sm:$0xff]  }
  0x93   :  { %512 = vmatpush1.bf16.msra.mxu1 %v1469_v35  ;;  %751 = vmatpush1.bf16.msra.mxu0 %v1494_v53  ;;  %v1535_v35 = vld [vmem:[#allocation9 + $0xe4] ss:$8 sps:$4 sm:$0xff]   ;;  %v1562_v53 = vld [vmem:[#allocation11 + $0x74] ss:$8 sps:$4 sm:$0xff]  }
  0x94   :  { %513 = vmatprep.subr.bf16.mxu1 %v1470_v36  ;;  %752 = vmatprep.subr.bf16.mxu0 %v1499_v54  ;;  %v1533_v36 = vld [vmem:[#allocation9 + $0xe0] ss:$8 sps:$4 sm:$0xff]   ;;  %v1560_v54 = vld [vmem:[#allocation11 + $0x70] ss:$8 sps:$4 sm:$0xff]  }
  0x97   :  { %514 = vmatpush1.bf16.msra.mxu1 %v1472_v37  ;;  %753 = vmatpush1.bf16.msra.mxu0 %v1497_v55  ;;  %v1538_v37 = vld [vmem:[#allocation9 + $0xf4] ss:$8 sps:$4 sm:$0xff]   ;;  %v1565_v55 = vld [vmem:[#allocation11 + $0x84] ss:$8 sps:$4 sm:$0xff]  }
  0x98   :  { %515 = vmatprep.subr.bf16.mxu1 %v1473_v38  ;;  %754 = vmatprep.subr.bf16.mxu0 %v1502_v56  ;;  %v1536_v38 = vld [vmem:[#allocation9 + $0xf0] ss:$8 sps:$4 sm:$0xff]   ;;  %v1563_v56 = vld [vmem:[#allocation11 + $0x80] ss:$8 sps:$4 sm:$0xff]  }
  0x9b   :  { %516 = vmatpush1.bf16.msra.mxu1 %v1475_v39  ;;  %755 = vmatpush1.bf16.msra.mxu0 %v1500_v57  ;;  %v1539_v39 = vld [vmem:[#allocation11] ss:$8 sps:$4 sm:$0xff]   ;;  %v1568_v57 = vld [vmem:[#allocation11 + $0x94] ss:$8 sps:$4 sm:$0xff]  }
  0x9c   :  { %517 = vmatprep.subr.bf16.mxu1 %v1476_v40  ;;  %756 = vmatprep.subr.bf16.mxu0 %v1505_v58  ;;  %v1541_v40 = vld [vmem:[#allocation11 + $0x4] ss:$8 sps:$4 sm:$0xff]   ;;  %v1566_v58 = vld [vmem:[#allocation11 + $0x90] ss:$8 sps:$4 sm:$0xff]  }
  0x9f   :  { %518 = vmatpush1.bf16.msra.mxu1 %v1478_v41  ;;  %757 = vmatpush1.bf16.msra.mxu0 %v1503_v59  ;;  %v1544_v41 = vld [vmem:[#allocation11 + $0x14] ss:$8 sps:$4 sm:$0xff]   ;;  %v1571_v59 = vld [vmem:[#allocation11 + $0xa4] ss:$8 sps:$4 sm:$0xff]  }
  0xa0   :  { %519 = vmatprep.subr.bf16.mxu1 %v1479_v42  ;;  %758 = vmatprep.subr.bf16.mxu0 %v1508_v60  ;;  %v1542_v42 = vld [vmem:[#allocation11 + $0x10] ss:$8 sps:$4 sm:$0xff]   ;;  %v1569_v60 = vld [vmem:[#allocation11 + $0xa0] ss:$8 sps:$4 sm:$0xff]  }
  0xa3   :  { %520 = vmatpush1.bf16.msra.mxu1 %v1481_v43  ;;  %759 = vmatpush1.bf16.msra.mxu0 %v1506_v61  ;;  %v1547_v43 = vld [vmem:[#allocation11 + $0x24] ss:$8 sps:$4 sm:$0xff]   ;;  %v1574_v61 = vld [vmem:[#allocation11 + $0xb4] ss:$8 sps:$4 sm:$0xff]  }
  0xa4   :  { %521 = vmatprep.subr.bf16.mxu1 %v1482_v44  ;;  %760 = vmatprep.subr.bf16.mxu0 %v1511_v62  ;;  %v1545_v44 = vld [vmem:[#allocation11 + $0x20] ss:$8 sps:$4 sm:$0xff]   ;;  %v1572_v62 = vld [vmem:[#allocation11 + $0xb0] ss:$8 sps:$4 sm:$0xff]  }
  0xa7   :  { %522 = vmatpush1.bf16.msra.mxu1 %v1484_v45  ;;  %761 = vmatpush1.bf16.msra.mxu0 %v1509_v63  ;;  %v1550_v45 = vld [vmem:[#allocation11 + $0x34] ss:$8 sps:$4 sm:$0xff]   ;;  %v1577_v63 = vld [vmem:[#allocation11 + $0xc4] ss:$8 sps:$4 sm:$0xff]  }
  0xa8   :  { %523 = vmatprep.subr.bf16.mxu1 %v1485_v46  ;;  %762 = vmatprep.subr.bf16.mxu0 %v1514_v0  ;;  %v1548_v46 = vld [vmem:[#allocation11 + $0x30] ss:$8 sps:$4 sm:$0xff]   ;;  %v1575_v0 = vld [vmem:[#allocation11 + $0xc0] ss:$8 sps:$4 sm:$0xff]  }
  0xab   :  { %524 = vmatpush1.bf16.msra.mxu1 %v1487_v47  ;;  %763 = vmatpush1.bf16.msra.mxu0 %v1512_v1  ;;  %v1553_v47 = vld [vmem:[#allocation11 + $0x44] ss:$8 sps:$4 sm:$0xff]   ;;  %v1580_v1 = vld [vmem:[#allocation11 + $0xd4] ss:$8 sps:$4 sm:$0xff]  }
  0xac   :  { %525 = vmatprep.subr.bf16.mxu1 %v1488_v48  ;;  %764 = vmatprep.subr.bf16.mxu0 %v1517_v2  ;;  %v1551_v48 = vld [vmem:[#allocation11 + $0x40] ss:$8 sps:$4 sm:$0xff]   ;;  %v1578_v2 = vld [vmem:[#allocation11 + $0xd0] ss:$8 sps:$4 sm:$0xff]  }
  0xaf   :  { %526 = vmatpush1.bf16.msra.mxu1 %v1490_v49  ;;  %765 = vmatpush1.bf16.msra.mxu0 %v1515_v3  ;;  %v1556_v49 = vld [vmem:[#allocation11 + $0x54] ss:$8 sps:$4 sm:$0xff]   ;;  %v323_v3 = vld [vmem:[%s1988_s5] sm:$0x3] }
  0xb0   :  { %766 = vmatprep.subr.bf16.mxu0 %v1520_v4  ;;  %1001 = vmatprep.subr.bf16.mxu1 %v1541_v40  ;;  %v328_v4 = vrot.slane %v323_v3, %v1938_v16 }
  0xb3   :  { %767 = vmatpush1.bf16.msra.mxu0 %v1518_v5  ;;  %v332_v5 = vrot.slane %v323_v3, %v1943_v18 }
  0xb4   :  { %768 = vmatprep.subr.bf16.mxu0 %v1523_v6 }
  0xb7   :  { %769 = vmatpush1.bf16.msra.mxu0 %v1521_v7 }
  0xb8   :  { %770 = vmatprep.subr.bf16.mxu0 %v1526_v8 }
  0xbb   :  { %771 = vmatpush1.bf16.msra.mxu0 %v1524_v9 }
  0xbc   :  { %772 = vmatprep.subr.bf16.mxu0 %v1529_v10 }
  0xbf   :  { %773 = vmatpush1.bf16.msra.mxu0 %v1527_v11 }
  0xc0   :  { %774 = vmatprep.subr.bf16.mxu0 %v1532_v12 }
  0xc3   :  { %775 = vmatpush1.bf16.msra.mxu0 %v1530_v13 }
  0xc4   :  { %776 = vmatprep.subr.bf16.mxu0 %v1535_v35  ;;  %v1596_v35 = vld [vmem:[#allocation12 + $0x20] sm:$0xff]  }
  0xc7   :  { %777 = vmatpush1.bf16.msra.mxu0 %v1533_v36  ;;  %v1597_v36 = vld [vmem:[#allocation12 + $0x68] sm:$0xff]  }
  0xc8   :  { %778 = vmatprep.subr.bf16.mxu0 %v1538_v37  ;;  %v576_v37 = vld [vmem:[%s1990_s7] sm:$0x3] }
  0xcb   :  { %779 = vmatpush1.bf16.msra.mxu0 %v1536_v38  ;;  %v581_v38 = vrot.slane %v576_v37, %v1938_v16 }
 0x161   :  { %v276_v21 = vpop.f32.mrb[0].mxu0 }
 0x162   :  { %v277_v22 = vadd.f32 %v276_v21, %v149_v19  ;;  %v278_v23 = vpop.f32.mrb[1].mxu0 }
 0x163   :  { %v279_v24 = vadd.f32 %v278_v23, %v153_v20  ;;  %v280_v25 = vpop.f32.mrb[2].mxu0  ;;  %v1581_v23 = vld [vmem:[#allocation11 + $0xe0] ss:$8 sps:$4 sm:$0xff]  }
 0x164   :  { %v281_v26 = vadd.f32 %v280_v25, %v149_v19  ;;  %v282_v27 = vpop.f32.mrb[3].mxu0  ;;  %v285_v29 = vmax.f32 %v277_v22, 0.0  ;;  %v1583_v22 = vld [vmem:[#allocation11 + $0xe4] ss:$8 sps:$4 sm:$0xff]   ;;  %v1584_v25 = vld [vmem:[#allocation11 + $0xf0] ss:$8 sps:$4 sm:$0xff]  }
 0x165   :  { %v283_v28 = vadd.f32 %v282_v27, %v153_v20  ;;  %v286_v31 = vmax.f32 %v279_v24, 0.0  ;;  %v1586_v24 = vld [vmem:[#allocation11 + $0xf4] ss:$8 sps:$4 sm:$0xff]   ;;  %v1588_v27 = vld [vmem:[#allocation12] sm:$0xff]  }
 0x166   :  { %v287_v30 = vmax.f32 %v281_v26, 0.0  ;;  %v1587_v26 = vld [vmem:[#allocation12 + $0x40] sm:$0xff]  }
 0x167   :  { %v288_v32 = vmax.f32 %v283_v28, 0.0  ;;  %v1589_v28 = vld [vmem:[#allocation12 + $0x48] sm:$0xff]   ;;  %1384 = vmatprep.subr.bf16.mxu0 %v1587_v26 }
 0x168   :  { %v289_v33 = vpack.c.bf16 %v287_v30, %v285_v29  ;;  %v1590_v29 = vld [vmem:[#allocation12 + $0x8] sm:$0xff]   ;;  %v1591_v30 = vld [vmem:[#allocation12 + $0x50] sm:$0xff]  }
 0x169   :  { %v290_v34 = vpack.c.bf16 %v288_v32, %v286_v31  ;;  %v1592_v31 = vld [vmem:[#allocation12 + $0x10] sm:$0xff]   ;;  %v1593_v32 = vld [vmem:[#allocation12 + $0x58] sm:$0xff]  }
 0x16b   :  { %527 = vmatprep.mubr.bf16.mxu1 %v290_v34  ;;  %v1595_v34 = vld [vmem:[#allocation12 + $0x60] sm:$0xff]  }
 0x16c   :  { %528 = vmatmul.mubr.bf16.vlgmr.msra.gmra.mrb[0].mxu1 %v289_v33  ;;  %v1594_v33 = vld [vmem:[#allocation12 + $0x18] sm:$0xff]  }
 0x16d   :  { %1002 = vmatpush1.bf16.msra.mxu1 %v1539_v39  ;;  %v585_v39 = vrot.slane %v576_v37, %v1943_v18 }
 0x16e   :  { %1003 = vmatprep.subr.bf16.mxu1 %v1544_v41 }
 0x171   :  { %1004 = vmatpush1.bf16.msra.mxu1 %v1542_v42 }
 0x172   :  { %1005 = vmatprep.subr.bf16.mxu1 %v1547_v43 }
 0x175   :  { %1006 = vmatpush1.bf16.msra.mxu1 %v1545_v44 }
 0x176   :  { %1007 = vmatprep.subr.bf16.mxu1 %v1550_v45 }
 0x179   :  { %1008 = vmatpush1.bf16.msra.mxu1 %v1548_v46 }
 0x17a   :  { %1009 = vmatprep.subr.bf16.mxu1 %v1553_v47 }
 0x17d   :  { %1010 = vmatpush1.bf16.msra.mxu1 %v1551_v48 }
 0x17e   :  { %1011 = vmatprep.subr.bf16.mxu1 %v1556_v49 }
 0x181   :  { %1012 = vmatpush1.bf16.msra.mxu1 %v1554_v50 }
 0x182   :  { %1013 = vmatprep.subr.bf16.mxu1 %v1559_v51 }
 0x185   :  { %1014 = vmatpush1.bf16.msra.mxu1 %v1557_v52 }
 0x186   :  { %1015 = vmatprep.subr.bf16.mxu1 %v1562_v53 }
 0x189   :  { %1016 = vmatpush1.bf16.msra.mxu1 %v1560_v54  ;;  %v1598_v54 = vld [vmem:[#allocation12 + $0x28] sm:$0xff]  }
 0x18a   :  { %1017 = vmatprep.subr.bf16.mxu1 %v1565_v55  ;;  %v1599_v55 = vld [vmem:[#allocation12 + $0x70] sm:$0xff]  }
 0x18d   :  { %1018 = vmatpush1.bf16.msra.mxu1 %v1563_v56  ;;  %v1600_v56 = vld [vmem:[#allocation12 + $0x30] sm:$0xff]  }
 0x18e   :  { %1019 = vmatprep.subr.bf16.mxu1 %v1568_v57  ;;  %v1601_v57 = vld [vmem:[#allocation12 + $0x78] sm:$0xff]  }
 0x191   :  { %1020 = vmatpush1.bf16.msra.mxu1 %v1566_v58  ;;  %v1602_v58 = vld [vmem:[#allocation12 + $0x38] sm:$0xff]  }
 0x192   :  { %1021 = vmatprep.subr.bf16.mxu1 %v1571_v59  ;;  %v829_v59 = vld [vmem:[%s1992_s9] sm:$0x3] }
 0x195   :  { %1022 = vmatpush1.bf16.msra.mxu1 %v1569_v60  ;;  %v834_v60 = vrot.slane %v829_v59, %v1938_v16  ;;  %v1367_v16 = vld [vmem:[%s1994_s11] ss:$0 sm:$0xff]  ;;  %s1739_s11 = scalar_lea.vmem %s1240_s28, 256 }
 0x196   :  { %1023 = vmatprep.subr.bf16.mxu1 %v1574_v61  ;;  %v838_v61 = vrot.slane %v829_v59, %v1943_v18  ;;  %p1740_p6 = scmp.ne.s32.totalorder %s1240_s28, %s1739_s11  ;;  %p1745_p8 = scmp.lt.s32.totalorder %s1739_s11, %s1739_s11 }
 0x198   :  { %p1746_p9 = por %p1745_p8, %p1744_p7 }
 0x199   :  { %1024 = vmatpush1.bf16.msra.mxu1 %v1572_v62 }
 0x19a   :  { %1025 = vmatprep.subr.bf16.mxu1 %v1577_v63  ;;  %p1747_p10 = pnand %p1746_p9, %p1740_p6 }
 0x19d   :  { %1026 = vmatpush1.bf16.msra.mxu1 %v1575_v0 }
 0x19e   :  { %1027 = vmatprep.subr.bf16.mxu1 %v1580_v1 }
 0x1a1   :  { %1028 = vmatpush1.bf16.msra.mxu1 %v1578_v2 }
 0x1a2   :  { %1029 = vmatprep.subr.bf16.mxu1 %v1583_v22 }
 0x1a5   :  { %1030 = vmatpush1.bf16.msra.mxu1 %v1581_v23 }
 0x1a6   :  { %1031 = vmatprep.subr.bf16.mxu1 %v1586_v24 }
 0x1a9   :  { %1032 = vmatpush1.bf16.msra.mxu1 %v1584_v25 }
 0x23f   :  { %v529_v6 = vpop.f32.mrb[0].mxu1 }
 0x240   :  { %v530_v7 = vadd.f32 %v529_v6, %v328_v4  ;;  %v531_v8 = vpop.f32.mrb[1].mxu1 }
 0x241   :  { %v532_v9 = vadd.f32 %v531_v8, %v332_v5  ;;  %v533_v10 = vpop.f32.mrb[2].mxu1 }
 0x242   :  { %v534_v11 = vadd.f32 %v533_v10, %v328_v4  ;;  %v535_v12 = vpop.f32.mrb[3].mxu1  ;;  %v538_v14 = vmax.f32 %v530_v7, 0.0 }
 0x243   :  { %v536_v13 = vadd.f32 %v535_v12, %v332_v5  ;;  %v539_v17 = vmax.f32 %v532_v9, 0.0 }
 0x244   :  { %v540_v15 = vmax.f32 %v534_v11, 0.0 }
 0x245   :  { %v541_v19 = vmax.f32 %v536_v13, 0.0 }
 0x246   :  { %v542_v20 = vpack.c.bf16 %v540_v15, %v538_v14 }
 0x247   :  { %v543_v21 = vpack.c.bf16 %v541_v19, %v539_v17 }
 0x249   :  { %780 = vmatprep.mubr.bf16.mxu0 %v543_v21  ;;  %v1229_v21 = vstv %s1983_s0 }
 0x24a   :  { %781 = vmatmul.mubr.bf16.vlgmr.msra.gmra.mrb[4].mxu0 %v542_v20 }
 0x24b   :  { %1385 = vmatpush3.bf16.msra.mxu0 %v1588_v27 }
 0x24c   :  { %1386 = vmatprep.subr.bf16.mxu0 %v1589_v28 }
 0x24f   :  { %1387 = vmatpush3.bf16.msra.mxu0 %v1590_v29 }
 0x250   :  { %1388 = vmatprep.subr.bf16.mxu0 %v1591_v30 }
 0x253   :  { %1389 = vmatpush3.bf16.msra.mxu0 %v1592_v31 }
 0x254   :  { %1390 = vmatprep.subr.bf16.mxu0 %v1593_v32 }
 0x257   :  { %1391 = vmatpush3.bf16.msra.mxu0 %v1594_v33 }
 0x258   :  { %1392 = vmatprep.subr.bf16.mxu0 %v1595_v34 }
 0x25b   :  { %1393 = vmatpush3.bf16.msra.mxu0 %v1596_v35 }
 0x25c   :  { %1394 = vmatprep.subr.bf16.mxu0 %v1597_v36 }
 0x25f   :  { %1395 = vmatpush3.bf16.msra.mxu0 %v1598_v54 }
 0x260   :  { %1396 = vmatprep.subr.bf16.mxu0 %v1599_v55 }
 0x263   :  { %1397 = vmatpush3.bf16.msra.mxu0 %v1600_v56 }
 0x264   :  { %1398 = vmatprep.subr.bf16.mxu0 %v1601_v57 }
 0x267   :  { %1399 = vmatpush3.bf16.msra.mxu0 %v1602_v58 }
 0x31d   :  { %v782_v40 = vpop.f32.mrb[4].mxu0 }
 0x31e   :  { %v783_v41 = vadd.f32 %v782_v40, %v581_v38  ;;  %v784_v42 = vpop.f32.mrb[5].mxu0 }
 0x31f   :  { %v785_v43 = vadd.f32 %v784_v42, %v585_v39  ;;  %v786_v44 = vpop.f32.mrb[6].mxu0 }
 0x320   :  { %v787_v45 = vadd.f32 %v786_v44, %v581_v38  ;;  %v788_v46 = vpop.f32.mrb[7].mxu0  ;;  %v791_v48 = vmax.f32 %v783_v41, 0.0 }
 0x321   :  { %v789_v47 = vadd.f32 %v788_v46, %v585_v39  ;;  %v792_v50 = vmax.f32 %v785_v43, 0.0 }
 0x322   :  { %v793_v49 = vmax.f32 %v787_v45, 0.0 }
 0x323   :  { %v794_v51 = vmax.f32 %v789_v47, 0.0 }
 0x324   :  { %v795_v52 = vpack.c.bf16 %v793_v49, %v791_v48 }
 0x325   :  { %v796_v53 = vpack.c.bf16 %v794_v51, %v792_v50 }
 0x327   :  { %1033 = vmatprep.mubr.bf16.mxu1 %v796_v53 }
 0x328   :  { %1034 = vmatmul.mubr.bf16.vlgmr.msra.gmra.mrb[4].mxu1 %v795_v52 }
 0x3fb   :  { %v1035_v62 = vpop.f32.mrb[4].mxu1 }
 0x3fc   :  { %v1036_v63 = vadd.f32 %v1035_v62, %v834_v60  ;;  %v1037_v0 = vpop.f32.mrb[5].mxu1 }
 0x3fd   :  { %v1038_v1 = vadd.f32 %v1037_v0, %v838_v61  ;;  %v1039_v2 = vpop.f32.mrb[6].mxu1 }
 0x3fe   :  { %v1040_v3 = vadd.f32 %v1039_v2, %v834_v60  ;;  %v1041_v4 = vpop.f32.mrb[7].mxu1  ;;  %v1044_v6 = vmax.f32 %v1036_v63, 0.0 }
 0x3ff   :  { %v1042_v5 = vadd.f32 %v1041_v4, %v838_v61  ;;  %v1045_v8 = vmax.f32 %v1038_v1, 0.0 }
 0x400   :  { %v1046_v7 = vmax.f32 %v1040_v3, 0.0 }
 0x401   :  { %v1047_v9 = vmax.f32 %v1042_v5, 0.0 }
 0x402   :  { %v1048_v10 = vpack.c.bf16 %v1046_v7, %v1044_v6 }
 0x403   :  { %v1049_v11 = vpack.c.bf16 %v1047_v9, %v1045_v8 }
 0x405   :  { %1217 = vmatprep.mubr.bf16.mxu0 %v1049_v11 }
 0x406   :  { %1218 = vmatmul.mubr.bf16.vlgmr.msra.gmra.mrb[8].mxu0 %v1048_v10 }
 0x4d9   :  { %v1400_v12 = vpop.f32.mrb[8].mxu0 }
 0x4da   :  { %v1401_v18 = vpop.f32.mrb[9].mxu0 }
 0x4db   :  { %v1402_v13 = vadd.f32 %v1401_v18, %v1400_v12  ;;  %v1403_v14 = vpop.f32.mrb[10].mxu0 }
 0x4dc   :  { %v1404_v15 = vpop.f32.mrb[11].mxu0 }
 0x4dd   :  { %v1220_v17 = vadd.f32 %v1402_v13, %v1367_v16  ;;  %v1405_v19 = vadd.f32 %v1404_v15, %v1403_v14 }
 0x4df   :  { %1603 = vtanh.f32 %v1220_v17  ;;  %v1223_v20 = vadd.f32 %v1405_v19, %v1367_v16 }
 0x4e1   :  { %1605 = vtanh.f32 %v1223_v20 }
 0x4e9   :  { %v1604_v22 = vpop.eup %1603 }
 0x4ea   :  { %v1230_v23 = vmul.f32 %v1604_v22, %v1229_v21 }
 0x4eb   :  { %v1606_v24 = vpop.eup %1605 }
 0x4ec   :  { %v1231_v25 = vmul.f32 %v1606_v24, %v1229_v21  ;;  %1232 = vst [vmem:[#allocation14] sm:$0xff] %v1230_v23 }
 0x4ee   :  { %1233 = vst [vmem:[#allocation14 + $0x8] sm:$0xff] %v1231_v25 }
 0x4ef   :  { %1750 = shalt.err (!%p1747_p10)
}
 0x4f0   :  { %s1751_s0 = scalar_lea.hbm %s1995_s12, 256 }
 0x4f1   :  { %p1752_p11 = scmp.ne.s32.totalorder %s1995_s12, %s1751_s0  ;;  %p1755_p12 = scmp.lt.u32.totalorder %s1751_s0, %s1995_s12 }
 0x4f3   :  { %p1757_p13 = pnand %p1755_p12, %p1752_p11 }
 0x4f5   :  { %1760 = shalt.err (!%p1757_p13)
}
 0x4f6   :  { %1245 = dma.vmem_to_hbm [thread:$0]  %s1240_s28, 256, %s1995_s12, [#allocation5], %s1772_s13, %s1772_s13, %s1773_s14  }
 0x4f7   :  { %1769 = dma.done.wait [#allocation5], 256  }
 0x4f8   :  { %1770 = vsyncadd [#allocation5], 4294967040 }
 0x4f9   :  { %1249 = vsyncpa [#allocation4], 1 }
 0x4fa   :  { %1250 = vsyncpa [#allocation7], 1 }
 0x4fb   :  { %1251 = vsyncpa [#allocation10], 1 }
 0x4fc   :  { %1252 = vsyncpa [#allocation13], 1 }
 0x4fd   :  { %1253 = vsyncpa [#allocation5], 1 }

</bundles_post_ra>
